<compile_context>
chip_gen: v7x
topology: tpu7x:2x2x1
jax: 0.10.0
libtpu: 0.0.40
codegen_flags: <defaults>
</compile_context>

<pallas_src>
import math

import jax
import jax.numpy as jnp
from jax.experimental import pallas as pl
from jax.experimental.pallas import tpu as pltpu

_SCALE = 1.999 * math.pi
_LANES = 128
_BLOCK_ROWS_MAX = 2048            # 2048 x 128 x 4 B = 1 MiB of f32 input/block
_KERNEL_DTYPES = (jnp.float32, jnp.bfloat16, jnp.float16)


def _int2phase_kernel(x_ref, out_ref):
    # Upcast in-register (VPU) so bf16/f16 inputs halve input HBM bytes.
    phase = x_ref[...].astype(jnp.float32) * jnp.float32(_SCALE)
    # Exact cos/sin (no shared-range-reduction shortcut: input is not
    # guaranteed to be in [0, 1]); kernel remains HBM-bound on v5e/v6e.
    out_ref[0] = jnp.cos(phase)
    out_ref[1] = jnp.sin(phase)


def _int2phase_2d(x2d: jax.Array) -> jax.Array:
    """(rows, 128) input -> (2, rows, 128) f32 output: [cos(phase), sin(phase)]."""
    rows, lanes = x2d.shape
    assert lanes == _LANES

    if rows <= _BLOCK_ROWS_MAX:
        # Whole tensor in one block / one grid step (<= 1 MiB of f32 input).
        # No forced 2-way split: that only helped v7x's dual TCs while adding
        # per-step overhead and shrinking DMAs on single-TC v5e / v6e.
        block_rows = rows
    else:
        # 1 MiB input blocks; the ragged last block is padded by Pallas and its
        # out-of-bounds results are discarded.
        block_rows = _BLOCK_ROWS_MAX

    grid = (pl.cdiv(rows, block_rows),)

    return pl.pallas_call(
        _int2phase_kernel,
        out_shape=jax.ShapeDtypeStruct((2, rows, _LANES), jnp.float32),
        grid_spec=pltpu.PrefetchScalarGridSpec(
            num_scalar_prefetch=0,
            grid=grid,
            in_specs=[pl.BlockSpec((block_rows, _LANES), lambda i: (i, 0))],
            # Single fused planar output -> one output DMA per grid step.
            out_specs=pl.BlockSpec((2, block_rows, _LANES),
                                   lambda i: (0, i, 0)),
        ),
        compiler_params=pltpu.CompilerParams(
            # With >= 2 natural grid steps this shards rows across v7x's two
            # TensorCores; no-op on single-TC v5e / v6e.
            dimension_semantics=("parallel",),
        ),
    )(x2d)


def nonlinear_int2phase_planar(input_field: jax.Array):
    """Pallas entry point: returns (cos(phase), sin(phase)) as two f32 arrays.

    Preferred when the consumer can take planar real/imag parts (e.g. a
    subsequent propagation step multiplying by a planar transfer function),
    since it skips the complex64 interleave entirely.
    """
    x = input_field
    if x.dtype not in _KERNEL_DTYPES:
        x = x.astype(jnp.float32)
    orig_shape = x.shape
    n = x.size

    if n == 0 or n % _LANES != 0:
        # Rare lane-unaligned total size: a pad + post-slice round trip would
        # roughly double HBM traffic, so let XLA fuse the whole call instead.
        phase = x.astype(jnp.float32) * jnp.float32(_SCALE)
        return jnp.cos(phase), jnp.sin(phase)

    stacked = _int2phase_2d(x.reshape(-1, _LANES))
    re = stacked[0].reshape(orig_shape)
    im = stacked[1].reshape(orig_shape)
    return re, im


def nonlinear_int2phase(input_field: jax.Array, *, via_pallas: bool = False):
    """JAX equivalent of NonLinear_Int2Phase.forward (complex64 output).

    Default: a single fused XLA elementwise pass (12 B/elem HBM traffic).
    via_pallas=True routes cos/sin through the Pallas planar kernel and then
    interleaves (28 B/elem) -- only worthwhile if the planar output is reused.
    """
    if via_pallas:
        re, im = nonlinear_int2phase_planar(input_field)
        # TODO(synk): complex64 interleave has no Pallas equivalent (Mosaic has
        # no complex dtype), so it is one extra XLA pass outside the kernel.
        return jax.lax.complex(re, im)
    phase = input_field.astype(jnp.float32) * jnp.float32(_SCALE)
    return jax.lax.complex(jnp.cos(phase), jnp.sin(phase))


if __name__ == "__main__":
    key = jax.random.PRNGKey(0)
    # Small NCHW input field consistent with the module's usage.
    x = jax.random.uniform(key, (2, 4, 16, 16), dtype=jnp.float32)

    # Plain-XLA reference.
    phase_ref = x * jnp.float32(_SCALE)
    ref_re, ref_im = jnp.cos(phase_ref), jnp.sin(phase_ref)
    ref_cplx = jax.lax.complex(ref_re, ref_im)

    # 1) Pallas planar kernel (the core implementation of the module compute).
    re, im = jax.jit(nonlinear_int2phase_planar)(x)
    jax.block_until_ready((re, im))
    assert re.shape == x.shape and im.shape == x.shape
    assert re.dtype == jnp.float32 and im.dtype == jnp.float32
    assert float(jnp.max(jnp.abs(re - ref_re))) < 1e-5
    assert float(jnp.max(jnp.abs(im - ref_im))) < 1e-5

    # 2) complex64 module forward routed through the Pallas kernel.
    out_p = jax.jit(lambda v: nonlinear_int2phase(v, via_pallas=True))(x)
    jax.block_until_ready(out_p)
    assert out_p.shape == x.shape and out_p.dtype == jnp.complex64
    assert float(jnp.max(jnp.abs(out_p - ref_cplx))) < 1e-5

    # 3) Default complex64 path (single XLA fusion, per perf review).
    out_x = jax.jit(nonlinear_int2phase)(x)
    jax.block_until_ready(out_x)
    assert out_x.shape == x.shape and out_x.dtype == jnp.complex64
    assert float(jnp.max(jnp.abs(out_x - ref_cplx))) < 1e-5

    # 4) bf16 input: upcast happens inside the kernel (no wrapper astype pass).
    xb = x.astype(jnp.bfloat16)
    re_b, im_b = jax.jit(nonlinear_int2phase_planar)(xb)
    jax.block_until_ready((re_b, im_b))
    pb = xb.astype(jnp.float32) * jnp.float32(_SCALE)
    assert float(jnp.max(jnp.abs(re_b - jnp.cos(pb)))) < 1e-5
    assert float(jnp.max(jnp.abs(im_b - jnp.sin(pb)))) < 1e-5

    # 5) Lane-unaligned shape -> pure-XLA fallback path.
    x2 = jax.random.uniform(jax.random.PRNGKey(1), (3, 5, 7), dtype=jnp.float32)
    out2 = jax.jit(nonlinear_int2phase)(x2)
    jax.block_until_ready(out2)
    p2 = x2 * jnp.float32(_SCALE)
    ref2 = jax.lax.complex(jnp.cos(p2), jnp.sin(p2))
    assert out2.shape == x2.shape and out2.dtype == jnp.complex64
    assert float(jnp.max(jnp.abs(out2 - ref2))) < 1e-5

    print("KERNEL_OK")
</pallas_src>

<mosaic_0001>
module attributes {stable_mosaic.version = 11 : i64} {
  func.func @_int2phase_kernel(%arg0: i32, %arg1: memref<16x128xf32, #tpu.memory_space<vmem>>, %arg2: memref<2x16x128xf32, #tpu.memory_space<vmem>>) attributes {dimension_semantics = [#tpu.dimension_semantics<parallel>], iteration_bounds = array<i64: 1>, scalar_prefetch = 0 : i64, scratch_operands = 0 : i64, tpu.core_type = #tpu.core_type<tc>, window_params = [{transform_indices = @transform_0, window_bounds = array<i64: 16, 128>}, {transform_indices = @transform_1, window_bounds = array<i64: 2, 16, 128>}]} {
    %c0 = arith.constant 0 : index
    %c0_0 = arith.constant 0 : index
    %0 = vector.load %arg1[%c0, %c0_0] : memref<16x128xf32, #tpu.memory_space<vmem>>, vector<16x128xf32>
    %cst = arith.constant 6.2800436 : f32
    %1 = vector.broadcast %cst : f32 to vector<16x128xf32>
    %2 = arith.mulf %0, %1 : vector<16x128xf32>
    %3 = math.cos %2 : vector<16x128xf32>
    %c0_1 = arith.constant 0 : index
    %c0_2 = arith.constant 0 : index
    %c0_3 = arith.constant 0 : index
    %4 = vector.load %arg2[%c0_1, %c0_2, %c0_3] : memref<2x16x128xf32, #tpu.memory_space<vmem>>, vector<1x16x128xf32>
    %5 = vector.shape_cast %4 : vector<1x16x128xf32> to vector<16x128xf32>
    %6 = vector.shape_cast %3 : vector<16x128xf32> to vector<1x16x128xf32>
    tpu.vector_store %arg2[%c0_1, %c0_2, %c0_3], %6 {strides = array<i32>} : memref<2x16x128xf32, #tpu.memory_space<vmem>>, vector<1x16x128xf32>,
    %7 = math.sin %2 : vector<16x128xf32>
    %c1 = arith.constant 1 : index
    %c0_4 = arith.constant 0 : index
    %c0_5 = arith.constant 0 : index
    %8 = vector.load %arg2[%c1, %c0_4, %c0_5] : memref<2x16x128xf32, #tpu.memory_space<vmem>>, vector<1x16x128xf32>
    %9 = vector.shape_cast %8 : vector<1x16x128xf32> to vector<16x128xf32>
    %10 = vector.shape_cast %7 : vector<16x128xf32> to vector<1x16x128xf32>
    tpu.vector_store %arg2[%c1, %c0_4, %c0_5], %10 {strides = array<i32>} : memref<2x16x128xf32, #tpu.memory_space<vmem>>, vector<1x16x128xf32>,
    return
  }
  func.func @transform_0(%arg0: i32) -> (i32, i32) {
    %c0_i32 = arith.constant 0 : i32
    %c0_i32_0 = arith.constant 0 : i32
    return %arg0, %c0_i32 : i32, i32
  }
  func.func @transform_1(%arg0: i32) -> (i32, i32, i32) {
    %c0_i32 = arith.constant 0 : i32
    %c0_i32_0 = arith.constant 0 : i32
    %c0_i32_1 = arith.constant 0 : i32
    return %c0_i32, %arg0, %c0_i32_0 : i32, i32, i32
  }
}

</mosaic_0001>

<bundles_post_ra>
// kernel: squeeze.3
= control target key start
LH: loop header
LB: loop body
LE: loop exit
PB: predicated region body
PF: predicated region fallthrough
CT: control target
= control target key end

     0   :  { %vm4_vm0 = vcmask 130048   ;;  %s184_s10 = smov 112   ;;  %s251_s0 = inlined_call_operand.vmem [shape: f32[1,16,128], index: 0, kind: input, shape index: {}]   ;;  %s252_s1 = inlined_call_operand.hbm [shape: f32[2,4,16,16], index: 1, kind: output, shape index: {}]  }
   0x1   :  { %v31_v0 = vld [vmem:[%s251_s0] sm:$0xff]   ;;  %v145_v1 = vld [vmem:[%s251_s0 + $0x8] sm:$0xff]   ;;  %s183_s0 = smov 96  }
   0x2   :  { %32 = vrot.lane.b32.xlu1 %v31_v0, %s183_s0  ;;  %15 = vrot.lane.b32.xlu0 %v31_v0, %s184_s10 }
   0x3   :  { %2 = vsyncpa [#allocation1], 0  ;;  %5 = vst.msk [vmem:[#allocation0] ss:$8 sm:$0xf] %vm4_vm0, %v31_v0   ;;  %s185_s11 = smov 80  }
   0x4   :  { %6 = vst.msk [vmem:[#allocation0] ss:$8 sm:$0xf0] %vm4_vm0, %v31_v0   ;;  %11 = vst.msk [vmem:[#allocation0 + $0x40] ss:$8 sm:$0xf] %vm4_vm0, %v145_v1  }
   0x5   :  { %13 = vst.msk [vmem:[#allocation0 + $0x40] ss:$8 sm:$0xf0] %vm4_vm0, %v145_v1   ;;  %s186_s12 = smov 64   ;;  %s187_s13 = smov 48  }
   0x6   :  { %41 = vrot.lane.b32.xlu1 %v145_v1, %s183_s0  ;;  %24 = vrot.lane.b32.xlu0 %v145_v1, %s184_s10  ;;  %s188_s14 = smov 32   ;;  %s189_s15 = smov 16  }
   0x7   :  { %s190_s16 = smov [#allocation0]  }
   0x8   :  { %s137_s17 = sshll.u32 %s190_s16, 4  ;;  %s138_s17 = int_to_ptr.vmem [resolvable:$true] %s137_s17 }
   0x9   :  { %s159_s18 = scalar_lea.vmem %s138_s17, 2048  ;;  %p164_p1 = scmp.lt.s32.totalorder %s138_s17, %s138_s17 }
   0xa   :  { %58 = vrot.lane.b32.xlu1 %v145_v1, %s185_s11  ;;  %49 = vrot.lane.b32.xlu0 %v31_v0, %s185_s11  ;;  %p160_p0 = scmp.ne.s32.totalorder %s138_s17, %s159_s18  ;;  %p165_p2 = scmp.lt.s32.totalorder %s159_s18, %s159_s18 }
   0xc   :  { %p166_p3 = por %p165_p2, %p164_p1 }
   0xe   :  { %75 = vrot.lane.b32.xlu1 %v145_v1, %s186_s12  ;;  %66 = vrot.lane.b32.xlu0 %v31_v0, %s186_s12  ;;  %p167_p4 = pnand %p166_p3, %p160_p0 }
  0x12   :  { %92 = vrot.lane.b32.xlu1 %v145_v1, %s187_s13  ;;  %83 = vrot.lane.b32.xlu0 %v31_v0, %s187_s13 }
  0x16   :  { %109 = vrot.lane.b32.xlu1 %v145_v1, %s188_s14  ;;  %100 = vrot.lane.b32.xlu0 %v31_v0, %s188_s14 }
  0x1a   :  { %126 = vrot.lane.b32.xlu1 %v145_v1, %s189_s15  ;;  %117 = vrot.lane.b32.xlu0 %v31_v0, %s189_s15 }
  0x74   :  { %v33_v2 = vpop.permute.xlu1 %32   ;;  %v16_v3 = vpop.permute.xlu0 %15  }
  0x75   :  { %36 = vst.msk [vmem:[#allocation0 + $0x2] ss:$8 sm:$0xf] %vm4_vm0, %v33_v2   ;;  %38 = vst.msk [vmem:[#allocation0 + $0x2] ss:$8 sm:$0xf0] %vm4_vm0, %v33_v2  }
  0x76   :  { %19 = vst.msk [vmem:[#allocation0 + $0x1] ss:$8 sm:$0xf] %vm4_vm0, %v16_v3   ;;  %21 = vst.msk [vmem:[#allocation0 + $0x1] ss:$8 sm:$0xf0] %vm4_vm0, %v16_v3  }
  0x78   :  { %v42_v4 = vpop.permute.xlu1 %41   ;;  %v25_v5 = vpop.permute.xlu0 %24  }
  0x79   :  { %45 = vst.msk [vmem:[#allocation0 + $0x42] ss:$8 sm:$0xf] %vm4_vm0, %v42_v4   ;;  %47 = vst.msk [vmem:[#allocation0 + $0x42] ss:$8 sm:$0xf0] %vm4_vm0, %v42_v4  }
  0x7a   :  { %28 = vst.msk [vmem:[#allocation0 + $0x41] ss:$8 sm:$0xf] %vm4_vm0, %v25_v5   ;;  %30 = vst.msk [vmem:[#allocation0 + $0x41] ss:$8 sm:$0xf0] %vm4_vm0, %v25_v5  }
  0x7c   :  { %v59_v6 = vpop.permute.xlu1 %58   ;;  %v50_v7 = vpop.permute.xlu0 %49  }
  0x7d   :  { %62 = vst.msk [vmem:[#allocation0 + $0x43] ss:$8 sm:$0xf] %vm4_vm0, %v59_v6   ;;  %64 = vst.msk [vmem:[#allocation0 + $0x43] ss:$8 sm:$0xf0] %vm4_vm0, %v59_v6  }
  0x7e   :  { %53 = vst.msk [vmem:[#allocation0 + $0x3] ss:$8 sm:$0xf] %vm4_vm0, %v50_v7   ;;  %55 = vst.msk [vmem:[#allocation0 + $0x3] ss:$8 sm:$0xf0] %vm4_vm0, %v50_v7  }
  0x80   :  { %v76_v8 = vpop.permute.xlu1 %75   ;;  %v67_v9 = vpop.permute.xlu0 %66  }
  0x81   :  { %79 = vst.msk [vmem:[#allocation0 + $0x44] ss:$8 sm:$0xf] %vm4_vm0, %v76_v8   ;;  %81 = vst.msk [vmem:[#allocation0 + $0x44] ss:$8 sm:$0xf0] %vm4_vm0, %v76_v8  }
  0x82   :  { %70 = vst.msk [vmem:[#allocation0 + $0x4] ss:$8 sm:$0xf] %vm4_vm0, %v67_v9   ;;  %72 = vst.msk [vmem:[#allocation0 + $0x4] ss:$8 sm:$0xf0] %vm4_vm0, %v67_v9  }
  0x84   :  { %v93_v10 = vpop.permute.xlu1 %92   ;;  %v84_v11 = vpop.permute.xlu0 %83  }
  0x85   :  { %96 = vst.msk [vmem:[#allocation0 + $0x45] ss:$8 sm:$0xf] %vm4_vm0, %v93_v10   ;;  %98 = vst.msk [vmem:[#allocation0 + $0x45] ss:$8 sm:$0xf0] %vm4_vm0, %v93_v10  }
  0x86   :  { %87 = vst.msk [vmem:[#allocation0 + $0x5] ss:$8 sm:$0xf] %vm4_vm0, %v84_v11   ;;  %89 = vst.msk [vmem:[#allocation0 + $0x5] ss:$8 sm:$0xf0] %vm4_vm0, %v84_v11  }
  0x88   :  { %v110_v12 = vpop.permute.xlu1 %109   ;;  %v101_v13 = vpop.permute.xlu0 %100  }
  0x89   :  { %113 = vst.msk [vmem:[#allocation0 + $0x46] ss:$8 sm:$0xf] %vm4_vm0, %v110_v12   ;;  %115 = vst.msk [vmem:[#allocation0 + $0x46] ss:$8 sm:$0xf0] %vm4_vm0, %v110_v12  }
  0x8a   :  { %104 = vst.msk [vmem:[#allocation0 + $0x6] ss:$8 sm:$0xf] %vm4_vm0, %v101_v13   ;;  %106 = vst.msk [vmem:[#allocation0 + $0x6] ss:$8 sm:$0xf0] %vm4_vm0, %v101_v13  }
  0x8c   :  { %v127_v14 = vpop.permute.xlu1 %126   ;;  %v118_v15 = vpop.permute.xlu0 %117  }
  0x8d   :  { %130 = vst.msk [vmem:[#allocation0 + $0x47] ss:$8 sm:$0xf] %vm4_vm0, %v127_v14   ;;  %132 = vst.msk [vmem:[#allocation0 + $0x47] ss:$8 sm:$0xf0] %vm4_vm0, %v127_v14  }
  0x8e   :  { %121 = vst.msk [vmem:[#allocation0 + $0x7] ss:$8 sm:$0xf] %vm4_vm0, %v118_v15   ;;  %123 = vst.msk [vmem:[#allocation0 + $0x7] ss:$8 sm:$0xf0] %vm4_vm0, %v118_v15  }
  0x8f   :  { %170 = shalt.err (!%p167_p4)
}
  0x90   :  { %s171_s21 = scalar_lea.hbm %s252_s1, 2048 }
  0x91   :  { %p172_p5 = scmp.ne.s32.totalorder %s252_s1, %s171_s21  ;;  %p175_p6 = scmp.lt.u32.totalorder %s171_s21, %s252_s1 }
  0x93   :  { %p177_p7 = pnand %p175_p6, %p172_p5 }
  0x95   :  { %180 = shalt.err (!%p177_p7)
}
  0x96   :  { %140 = dma.vmem_to_hbm [thread:$0]  %s138_s17, 2048, %s252_s1, [#allocation1]  }
  0x97   :  { %181 = dma.done.wait [#allocation1], 2048  }
  0x98   :  { %182 = vsyncadd [#allocation1], 4294965248 }
  0x99   :  { %142 = vsyncpa [#allocation1], 1 }

// kernel: nonlinear_int2phase_planar.1
= control target key start
LH: loop header
LB: loop body
LE: loop exit
PB: predicated region body
PF: predicated region fallthrough
CT: control target
= control target key end

     0   :  { %v475_v26 = vmov 683565275   ;;  %v476_v28 = vmov 2475754826   ;;  %v477_v30 = vmov 2131351028   ;;  %s579_s0 = inlined_call_operand.vmem [shape: f32[16,128], index: 0, kind: input, shape index: {}]   ;;  %s580_s1 = inlined_call_operand.vmem [shape: f32[2,16,128], index: 1, kind: output, shape index: {}]  }
   0x1   :  { %v8_v0 = vld [vmem:[%s579_s0] sm:$0xff]  ;;  %v9_v1 = vld [vmem:[%s579_s0 + $0x8] sm:$0xff]  ;;  %v478_v32 = vmov 2102212464   ;;  %v479_v34 = vmov 920167782  }
   0x2   :  { %v497_v2 = vmul.f32 6.2800436, %v8_v0  ;;  %v499_v3 = vmul.f32 6.2800436, %v9_v1  ;;  %v480_v42 = vmov 1326507024  }
   0x4   :  { %v12_v4 = vand.u32 2147483647, %v497_v2  ;;  %v15_v5 = vand.u32 2139095040, %v497_v2  ;;  %v115_v6 = vand.u32 2147483647, %v499_v3  ;;  %v118_v7 = vand.u32 2139095040, %v499_v3 }
   0x5   :  { %vm14_vm14 = vcmp.lt.s32.totalorder %v497_v2, 0 }
   0x6   :  { %v16_v8 = vshrl.u32 %v15_v5, 23  ;;  %v19_v9 = vand.u32 8388607, %v12_v4  ;;  %v119_v10 = vshrl.u32 %v118_v7, 23  ;;  %v122_v11 = vand.u32 8388607, %v115_v6 }
   0x7   :  { %vm13_vm15 = vcmp.le.f32.partialorder %v12_v4, 0.7853982 }
   0x8   :  { %v435_v12 = vadd.s32 4294967169, %v16_v8  ;;  %v439_v13 = vadd.s32 4294967169, %v119_v10  ;;  %v20_v15 = vor.u32 8388608, %v19_v9  ;;  %v123_v16 = vor.u32 8388608, %v122_v11 }
   0xa   :  { %v22_v14 = vadd.s32 1, %v435_v12  ;;  %v125_v17 = vadd.s32 1, %v439_v13  ;;  %v509_v22 = vshll.u32 %v20_v15, 8  ;;  %v511_v24 = vshll.u32 %v123_v16, 8 }
   0xc   :  { %vm23_vm0 = vcmp.gt.s32.totalorder %v22_v14, 0  ;;  %vm126_vm1 = vcmp.gt.s32.totalorder %v125_v17, 0 }
   0xd   :  { %v24_v18 = vsel %vm23_vm0, %v22_v14, 0  ;;  %v127_v21 = vsel %vm126_vm1, %v125_v17, 0  ;;  %vm117_vm0 = vcmp.lt.s32.totalorder %v499_v3, 0  ;;  %vm116_vm1 = vcmp.le.f32.partialorder %v115_v6, 0.7853982 }
   0xe   :  { %v25_v19 = vshrl.u32 %v24_v18, 5  ;;  %v26_v20 = vand.u32 31, %v24_v18  ;;  %v129_v23 = vand.u32 31, %v127_v21  ;;  %v513_v36 = vshrl.u32 %v127_v21, 5 }
  0x10   :  { %v27_v25 = vsub.s32 32, %v26_v20  ;;  %v29_v27 = vshll.u32 %v475_v26, %v26_v20  ;;  %v32_v29 = vshll.u32 %v476_v28, %v26_v20  ;;  %v35_v31 = vshll.u32 %v477_v30, %v26_v20 }
  0x11   :  { %v38_v33 = vshll.u32 %v478_v32, %v26_v20  ;;  %v41_v35 = vshll.u32 %v479_v34, %v26_v20  ;;  %vm44_vm2 = vcmp.lt.s32.totalorder %v25_v19, 1  ;;  %vm45_vm3 = vcmp.lt.s32.totalorder %v25_v19, 2 }
  0x12   :  { %v28_v37 = vshrl.u32 %v475_v26, %v27_v25  ;;  %v30_v38 = vshrl.u32 %v476_v28, %v27_v25  ;;  %v33_v39 = vshrl.u32 %v477_v30, %v27_v25  ;;  %v36_v40 = vshrl.u32 %v478_v32, %v27_v25 }
  0x13   :  { %v39_v41 = vshrl.u32 %v479_v34, %v27_v25  ;;  %v42_v43 = vshrl.u32 %v480_v42, %v27_v25  ;;  %vm47_vm4 = vcmp.lt.s32.totalorder %v25_v19, 4  ;;  %v130_v47 = vsub.s32 32, %v129_v23 }
  0x14   :  { %v31_v44 = vor.u32 %v30_v38, %v29_v27  ;;  %v34_v45 = vor.u32 %v33_v39, %v32_v29  ;;  %v37_v46 = vor.u32 %v36_v40, %v35_v31  ;;  %vm46_vm5 = vcmp.lt.s32.totalorder %v25_v19, 3 }
  0x15   :  { %v40_v48 = vor.u32 %v39_v41, %v38_v33  ;;  %v43_v49 = vor.u32 %v42_v43, %v41_v35  ;;  %v132_v50 = vshll.u32 %v475_v26, %v129_v23  ;;  %v135_v58 = vshll.u32 %v476_v28, %v129_v23 }
  0x16   :  { %v48_v51 = vsel %vm44_vm2, %v28_v37, %v31_v44  ;;  %v49_v52 = vsel %vm47_vm4, %v37_v46, 2102212464  ;;  %v52_v53 = vsel %vm44_vm2, %v31_v44, %v34_v45  ;;  %v56_v54 = vsel %vm44_vm2, %v34_v45, %v37_v46 }
  0x17   :  { %v50_v55 = vsel %vm46_vm5, %v34_v45, %v49_v52  ;;  %v53_v56 = vsel %vm47_vm4, %v40_v48, 920167782  ;;  %v57_v57 = vsel %vm47_vm4, %v43_v49, 1326507024  ;;  %v131_v61 = vshrl.u32 %v475_v26, %v130_v47 }
  0x18   :  { %v54_v59 = vsel %vm46_vm5, %v37_v46, %v53_v56  ;;  %v58_v60 = vsel %vm46_vm5, %v40_v48, %v57_v57  ;;  %v133_v62 = vshrl.u32 %v476_v28, %v130_v47  ;;  %v51_v63 = vsel %vm45_vm3, %v48_v51, %v50_v55 }
  0x19   :  { %v55_v0 = vsel %vm45_vm3, %v52_v53, %v54_v59  ;;  %v59_v1 = vsel %vm45_vm3, %v56_v54, %v58_v60  ;;  %v136_v5 = vshrl.u32 %v477_v30, %v130_v47  ;;  %v138_v13 = vshll.u32 %v477_v30, %v129_v23 }
  0x1a   :  { %v522_v7 = vmul.u32.u64.low %v509_v22, %v59_v1  ;;  %v523_v8 = vmul.u32.u64.high %v509_v22, %v59_v1, %v522_v7  ;;  %v526_v9 = vmul.u32.u64.low %v509_v22, %v55_v0  ;;  %v527_v10 = vmul.u32.u64.high %v509_v22, %v55_v0, %v526_v9 }
  0x1b   :  { %v134_v11 = vor.u32 %v133_v62, %v132_v50  ;;  %v137_v12 = vor.u32 %v136_v5, %v135_v58  ;;  %v139_v14 = vshrl.u32 %v478_v32, %v130_v47  ;;  %v141_v15 = vshll.u32 %v478_v32, %v129_v23 }
  0x1c   :  { %v142_v16 = vshrl.u32 %v479_v34, %v130_v47  ;;  %v144_v17 = vshll.u32 %v479_v34, %v129_v23  ;;  %v145_v18 = vshrl.u32 %v480_v42, %v130_v47  ;;  %v67_v19 = vmul.u32 %v509_v22, %v51_v63 }
  0x1d   :  { %v140_v20 = vor.u32 %v139_v14, %v138_v13  ;;  %vm147_vm6 = vcmp.lt.s32.totalorder %v513_v36, 1  ;;  %vm148_vm7 = vcmp.lt.s32.totalorder %v513_v36, 2  ;;  %vm69_vm8 = vc.u32 %v523_v8, %v526_v9 }
  0x1e   :  { %v70_v21 = vadd.s32 1, %v527_v10  ;;  %v143_v25 = vor.u32 %v142_v16, %v141_v15  ;;  %vm149_vm9 = vcmp.lt.s32.totalorder %v513_v36, 3  ;;  %v146_v26 = vor.u32 %v145_v18, %v144_v17 }
  0x1f   :  { %vm150_vm10 = vcmp.lt.s32.totalorder %v513_v36, 4  ;;  %v151_v27 = vsel %vm147_vm6, %v131_v61, %v134_v11  ;;  %v155_v23 = vsel %vm147_vm6, %v134_v11, %v137_v12  ;;  %v159_v30 = vsel %vm147_vm6, %v137_v12, %v140_v20 }
  0x20   :  { %v71_v28 = vsel %vm69_vm8, %v70_v21, %v527_v10  ;;  %v152_v22 = vsel %vm150_vm10, %v140_v20, 2102212464  ;;  %v156_v29 = vsel %vm150_vm10, %v143_v25, 920167782  ;;  %v160_v34 = vsel %vm150_vm10, %v146_v26, 1326507024 }
  0x21   :  { %v72_v31 = vadd.s32 %v71_v28, %v67_v19  ;;  %v153_v32 = vsel %vm149_vm9, %v137_v12, %v152_v22  ;;  %v157_v33 = vsel %vm149_vm9, %v140_v20, %v156_v29  ;;  %v161_v38 = vsel %vm149_vm9, %v143_v25, %v160_v34 }
  0x22   :  { %v154_v35 = vsel %vm148_vm7, %v151_v27, %v153_v32  ;;  %v158_v37 = vsel %vm148_vm7, %v155_v23, %v157_v33  ;;  %v162_v40 = vsel %vm148_vm7, %v159_v30, %v161_v38  ;;  %v68_v59 = vadd.s32 %v526_v9, %v523_v8 }
  0x23   :  { %v73_v39 = vadd.s32 536870912, %v72_v31  ;;  %v544_v41 = vmul.u32.u64.low %v511_v24, %v158_v37  ;;  %v545_v42 = vmul.u32.u64.high %v511_v24, %v158_v37, %v544_v41  ;;  %v170_v46 = vmul.u32 %v511_v24, %v154_v35 }
  0x24   :  { %v548_v43 = vmul.u32.u64.low %v511_v24, %v162_v40  ;;  %v549_v44 = vmul.u32.u64.high %v511_v24, %v162_v40, %v548_v43  ;;  %vm104_vm8 = vweird.f32 %v497_v2 }
  0x25   :  { %v74_v45 = vshrl.u32 %v73_v39, 30  ;;  %v173_v48 = vadd.s32 1, %v545_v42 }
  0x26   :  { %vm172_vm11 = vc.u32 %v549_v44, %v544_v41  ;;  %v171_v15 = vadd.s32 %v544_v41, %v549_v44 }
  0x27   :  { %v75_v47 = vshll.u32 %v74_v45, 30  ;;  %v174_v36 = vsel %vm172_vm11, %v173_v48, %v545_v42  ;;  %v98_v8 = vsub.s32 4, %v74_v45 }
  0x28   :  { %v175_v50 = vadd.s32 %v174_v36, %v170_v46 }
  0x29   :  { %v76_v49 = vsub.s32 %v72_v31, %v75_v47  ;;  %v99_v27 = vsel %vm14_vm14, %v98_v8, %v74_v45 }
  0x2a   :  { %v176_v52 = vadd.s32 536870912, %v175_v50  ;;  %v101_v30 = vsel %vm13_vm15, 0, %v99_v27 }
  0x2b   :  { %v78_v51 = vsub.s32 0, %v76_v49  ;;  %v313_v35 = vadd.s32 3, %v101_v30  ;;  %v105_v39 = vand.u32 3, %v101_v30 }
  0x2c   :  { %v177_v54 = vshrl.u32 %v176_v52, 30 }
  0x2d   :  { %v436_v53 = vmin.u32 %v78_v51, %v76_v49  ;;  %v314_v40 = vand.u32 3, %v313_v35  ;;  %vm110_vm2 = vcmp.eq.s32.totalorder %v105_v39, 2  ;;  %vm107_vm4 = vcmp.eq.s32.totalorder %v105_v39, 0 }
  0x2e   :  { %v178_v56 = vshll.u32 %v177_v54, 30  ;;  %v201_v34 = vsub.s32 4, %v177_v54  ;;  %vm106_vm6 = vcmp.lt.s32.totalorder %v105_v39, 2 }
  0x2f   :  { %v80_v55 = vclz %v436_v53  ;;  %vm319_vm3 = vcmp.eq.s32.totalorder %v314_v40, 2  ;;  %vm316_vm5 = vcmp.eq.s32.totalorder %v314_v40, 0  ;;  %vm315_vm7 = vcmp.lt.s32.totalorder %v314_v40, 2 }
  0x30   :  { %v179_v58 = vsub.s32 %v175_v50, %v178_v56  ;;  %v202_v38 = vsel %vm117_vm0, %v201_v34, %v177_v54 }
  0x31   :  { %v437_v57 = vadd.s32 4294967294, %v80_v55  ;;  %v204_v43 = vsel %vm116_vm1, 0, %v202_v38 }
  0x32   :  { %v181_v60 = vsub.s32 0, %v179_v58  ;;  %v417_v47 = vadd.s32 3, %v204_v43  ;;  %v208_v52 = vand.u32 3, %v204_v43 }
  0x33   :  { %vm438_vm12 = vcmp.lt.s32.totalorder %v437_v57, 0 }
  0x34   :  { %v83_v24 = vsel %vm438_vm12, 0, %v437_v57  ;;  %v440_v0 = vmin.u32 %v181_v60, %v179_v58  ;;  %v418_v54 = vand.u32 3, %v417_v47  ;;  %vm213_vm9 = vcmp.eq.s32.totalorder %v208_v52, 2 }
  0x35   :  { %v84_v61 = vsub.s32 32, %v83_v24  ;;  %v85_v62 = vshll.u32 %v76_v49, %v83_v24  ;;  %v88_v63 = vsub.s32 4294967266, %v83_v24  ;;  %vm210_vm11 = vcmp.eq.s32.totalorder %v208_v52, 0 }
  0x36   :  { %v183_v7 = vclz %v440_v0  ;;  %vm423_vm10 = vcmp.eq.s32.totalorder %v418_v54, 2  ;;  %vm420_vm12 = vcmp.eq.s32.totalorder %v418_v54, 0 }
  0x37   :  { %v86_v1 = vshrl.u32 %v68_v59, %v84_v61  ;;  %v89_v5 = vadd.s32 127, %v88_v63 }
  0x38   :  { %v441_v12 = vadd.s32 4294967294, %v183_v7 }
  0x39   :  { %v87_v10 = vor.u32 %v86_v1, %v85_v62  ;;  %v90_v11 = vshll.u32 %v89_v5, 23 }
  0x3a   :  { %vm442_vm13 = vcmp.lt.s32.totalorder %v441_v12, 0 }
  0x3b   :  { %v91_v13 = vor.u32 4788187, %v90_v11  ;;  %v94_v14 = vcvt.s32.f32 %v87_v10  ;;  %v186_v9 = vsel %vm442_vm13, 0, %v441_v12  ;;  %vm209_vm13 = vcmp.lt.s32.totalorder %v208_v52, 2 }
  0x3c   :  { %v187_v17 = vsub.s32 32, %v186_v9  ;;  %v188_v18 = vshll.u32 %v179_v58, %v186_v9  ;;  %v191_v19 = vsub.s32 4294967266, %v186_v9 }
  0x3d   :  { %v92_v16 = vand.u32 2147483647, %v91_v13 }
  0x3e   :  { %v189_v21 = vshrl.u32 %v171_v15, %v187_v17  ;;  %v192_v25 = vadd.s32 127, %v191_v19 }
  0x3f   :  { %v95_v20 = vmul.f32 %v94_v14, %v92_v16 }
  0x40   :  { %v190_v23 = vor.u32 %v189_v21, %v188_v18  ;;  %v193_v28 = vshll.u32 %v192_v25, 23 }
  0x41   :  { %v96_v26 = vxor.u32 2147483648, %v95_v20 }
  0x42   :  { %v194_v31 = vor.u32 4788187, %v193_v28  ;;  %v197_v32 = vcvt.s32.f32 %v190_v23 }
  0x43   :  { %v97_v22 = vsel %vm14_vm14, %v96_v26, %v95_v20  ;;  %vm419_vm14 = vcmp.lt.s32.totalorder %v418_v54, 2 }
  0x44   :  { %v100_v29 = vsel %vm13_vm15, %v497_v2, %v97_v22  ;;  %v195_v33 = vand.u32 2147483647, %v194_v31  ;;  %vm207_vm15 = vweird.f32 %v499_v3 }
  0x45   :  { %467 = vcosq.f32 %v100_v29 }
  0x46   :  { %469 = vsinq.f32 %v100_v29  ;;  %v198_v37 = vmul.f32 %v197_v32, %v195_v33 }
  0x48   :  { %v199_v4 = vxor.u32 2147483648, %v198_v37 }
  0x4a   :  { %v200_v41 = vsel %vm117_vm0, %v199_v4, %v198_v37 }
  0x4b   :  { %v203_v42 = vsel %vm116_vm1, %v499_v3, %v200_v41 }
  0x4c   :  { %471 = vcosq.f32 %v203_v42 }
  0x4d   :  { %473 = vsinq.f32 %v203_v42 }
  0x4f   :  { %v468_v44 = vpop.eup %467 }
  0x50   :  { %v470_v45 = vpop.eup %469  ;;  %v111_v46 = vxor.u32 2147483648, %v468_v44 }
  0x51   :  { %v108_v6 = vxor.u32 2147483648, %v470_v45 }
  0x52   :  { %v112_v48 = vsel %vm110_vm2, %v111_v46, %v470_v45  ;;  %v321_v49 = vsel %vm319_vm3, %v111_v46, %v470_v45 }
  0x53   :  { %v109_v36 = vsel %vm107_vm4, %v468_v44, %v108_v6  ;;  %v318_v50 = vsel %vm316_vm5, %v468_v44, %v108_v6 }
  0x54   :  { %v113_v51 = vsel %vm106_vm6, %v109_v36, %v112_v48  ;;  %v322_v53 = vsel %vm315_vm7, %v318_v50, %v321_v49 }
  0x55   :  { %v114_v55 = vsel %vm104_vm8, nan, %v113_v51  ;;  %v323_v56 = vsel %vm104_vm8, nan, %v322_v53 }
  0x56   :  { %218 = vst [vmem:[%s580_s1] sm:$0xff] %v114_v55  ;;  %451 = vst [vmem:[%s580_s1 + $0x10] sm:$0xff] %v323_v56  ;;  %v472_v57 = vpop.eup %471 }
  0x57   :  { %v474_v2 = vpop.eup %473  ;;  %v214_v58 = vxor.u32 2147483648, %v472_v57 }
  0x58   :  { %v211_v59 = vxor.u32 2147483648, %v474_v2 }
  0x59   :  { %v215_v24 = vsel %vm213_vm9, %v214_v58, %v474_v2  ;;  %v425_v60 = vsel %vm423_vm10, %v214_v58, %v474_v2 }
  0x5a   :  { %v212_v61 = vsel %vm210_vm11, %v472_v57, %v211_v59  ;;  %v422_v62 = vsel %vm420_vm12, %v472_v57, %v211_v59 }
  0x5b   :  { %v216_v63 = vsel %vm209_vm13, %v212_v61, %v215_v24  ;;  %v426_v0 = vsel %vm419_vm14, %v422_v62, %v425_v60 }
  0x5c   :  { %v217_v1 = vsel %vm207_vm15, nan, %v216_v63  ;;  %v427_v5 = vsel %vm207_vm15, nan, %v426_v0 }
  0x5d   :  { %219 = vst [vmem:[%s580_s1 + $0x8] sm:$0xff] %v217_v1  ;;  %452 = vst [vmem:[%s580_s1 + $0x18] sm:$0xff] %v427_v5 }

</bundles_post_ra>
